<compile_context>
chip_gen: v5e
topology: v5e:2x2
jax: 0.10.0
libtpu: 0.0.40
codegen_flags: <defaults>
</compile_context>

<pallas_src>
import jax
import jax.numpy as jnp
from jax.experimental import pallas as pl
from jax.experimental.pallas import tpu as pltpu


def _round_up(a: int, b: int) -> int:
    return ((a + b - 1) // b) * b


def predictor_kernel(x_ref, w_ref, o_ref):
    # Hot path: bf16 matmul on the MXU with f32 accumulate, fused ReLU on the VPU.
    acc = jnp.dot(x_ref[...], w_ref[...], preferred_element_type=jnp.float32)
    o_ref[...] = jnp.maximum(acc, 0.0).astype(o_ref.dtype)


def predictor_forward(x, w_pt, *, tm=512, compute_dtype=jnp.bfloat16):
    """Forward of Predictor: relu(x @ W_pt.T).

    x:    (B, in_dim)  float32 activations
    w_pt: (out_dim, in_dim) float32 weight in PyTorch nn.Linear layout
    returns: (B, out_dim) float32
    """
    B, K = x.shape
    N, K2 = w_pt.shape
    assert K == K2, "in_dim mismatch between x and weight"

    out_dtype = x.dtype

    # ---- padding / tiling decisions -------------------------------------
    # Lane-dense output: pad out_dim to a multiple of 128 (unmasked stores).
    N_pad = _round_up(N, 128)
    # Batch tile: big tiles amortize ~0.35us/step pipeline overhead; for tiny
    # batches collapse to a single block (no pipeline prologue/epilogue).
    tm_eff = min(tm, _round_up(B, 8))
    B_pad = _round_up(B, tm_eff)

    # ---- prepare operands (bf16 halves HBM traffic) ----------------------
    w = w_pt.T  # (K, N) so the MXU computes x @ w == x @ W_pt.T
    x_p = jnp.zeros((B_pad, K), dtype=compute_dtype).at[:B, :].set(
        x.astype(compute_dtype))
    w_p = jnp.zeros((K, N_pad), dtype=compute_dtype).at[:, :N].set(
        w.astype(compute_dtype))

    grid = (B_pad // tm_eff,)

    # ---- VMEM budget: double-buffered x/out tiles + resident weight ------
    in_bytes = jnp.dtype(compute_dtype).itemsize
    out_bytes = jnp.dtype(out_dtype).itemsize
    working = (2 * tm_eff * K * in_bytes          # x tile, double-buffered
               + 2 * K * N_pad * in_bytes         # weight (constant index)
               + 2 * tm_eff * N_pad * out_bytes)  # out tile, double-buffered
    vmem_limit = min(max(2 * working, 4 * 1024 * 1024), 32 * 1024 * 1024)

    cost = pl.CostEstimate(
        flops=2 * B_pad * K * N_pad,
        transcendentals=0,
        bytes_accessed=(B_pad * K * in_bytes
                        + K * N_pad * in_bytes
                        + B_pad * N_pad * out_bytes),
    )

    out_padded = pl.pallas_call(
        predictor_kernel,
        out_shape=jax.ShapeDtypeStruct((B_pad, N_pad), out_dtype),
        grid_spec=pltpu.PrefetchScalarGridSpec(
            num_scalar_prefetch=0,
            grid=grid,
            in_specs=[
                # batch tile of activations
                pl.BlockSpec((tm_eff, K), lambda i: (i, 0)),
                # full (padded) weight, resident across the batch axis
                pl.BlockSpec((K, N_pad), lambda i: (0, 0)),
            ],
            out_specs=pl.BlockSpec((tm_eff, N_pad), lambda i: (i, 0)),
        ),
        compiler_params=pltpu.CompilerParams(
            dimension_semantics=("parallel",),
            vmem_limit_bytes=vmem_limit,
        ),
        cost_estimate=cost,
    )(x_p, w_p)

    # Slice away batch / lane padding outside the kernel.
    return out_padded[:B, :N]


if __name__ == "__main__":
    key = jax.random.PRNGKey(0)
    kx, kw = jax.random.split(key)

    B, in_dim, out_dim = 16, 32, 64

    x = jax.random.normal(kx, (B, in_dim), dtype=jnp.float32)
    # Deterministic Linear weight init (PyTorch layout: (out_dim, in_dim)),
    # uniform(-1/sqrt(in_dim), 1/sqrt(in_dim)) like nn.Linear's default.
    bound = 1.0 / (in_dim ** 0.5)
    w_pt = jax.random.uniform(kw, (out_dim, in_dim), dtype=jnp.float32,
                              minval=-bound, maxval=bound)

    out = predictor_forward(x, w_pt)
    out = jax.block_until_ready(out)

    # Reference check: kernel computes in bf16 with f32 accumulation, so
    # compare against the same bf16-rounded operands in plain JAX.
    x_bf = x.astype(jnp.bfloat16).astype(jnp.float32)
    w_bf = w_pt.astype(jnp.bfloat16).astype(jnp.float32)
    ref = jnp.maximum(x_bf @ w_bf.T, 0.0)

    assert out.shape == (B, out_dim)
    assert out.dtype == jnp.float32
    assert jnp.allclose(out, ref, atol=1e-3, rtol=1e-3), "mismatch vs reference"

    print("KERNEL_OK")
</pallas_src>

<mosaic_0001>
module attributes {stable_mosaic.version = 11 : i64} {
  func.func @predictor_kernel(%arg0: i32, %arg1: memref<16x32xbf16, #tpu.memory_space<vmem>>, %arg2: memref<32x128xbf16, #tpu.memory_space<vmem>>, %arg3: memref<16x128xf32, #tpu.memory_space<vmem>>) attributes {dimension_semantics = [#tpu.dimension_semantics<parallel>], iteration_bounds = array<i64: 1>, scalar_prefetch = 0 : i64, scratch_operands = 0 : i64, tpu.core_type = #tpu.core_type<tc>, window_params = [{transform_indices = @transform_0, window_bounds = array<i64: 16, 32>}, {pipeline_mode = #tpu.pipeline_mode<synchronous>, transform_indices = @transform_1, window_bounds = array<i64: 32, 128>}, {transform_indices = @transform_2, window_bounds = array<i64: 16, 128>}]} {
    %c0 = arith.constant 0 : index
    %c0_0 = arith.constant 0 : index
    %0 = vector.load %arg1[%c0, %c0_0] : memref<16x32xbf16, #tpu.memory_space<vmem>>, vector<16x32xbf16>
    %c0_1 = arith.constant 0 : index
    %c0_2 = arith.constant 0 : index
    %1 = vector.load %arg2[%c0_1, %c0_2] : memref<32x128xbf16, #tpu.memory_space<vmem>>, vector<32x128xbf16>
    %cst = arith.constant dense<0.000000e+00> : vector<16x128xf32>
    %2 = tpu.matmul %0, %1, %cst {dimension_numbers = #tpu.dot_dimension_numbers<[1], [0], [0], [1], [0, 0, 1, 1], [], []>} : vector<16x32xbf16>, vector<32x128xbf16>, vector<16x128xf32> -> vector<16x128xf32>
    %cst_3 = arith.constant 0.000000e+00 : f32
    %3 = vector.broadcast %cst_3 : f32 to vector<16x128xf32>
    %4 = arith.maximumf %2, %3 : vector<16x128xf32>
    %c0_4 = arith.constant 0 : index
    %c0_5 = arith.constant 0 : index
    %5 = vector.load %arg3[%c0_4, %c0_5] : memref<16x128xf32, #tpu.memory_space<vmem>>, vector<16x128xf32>
    tpu.vector_store %arg3[%c0_4, %c0_5], %4 {strides = array<i32>} : memref<16x128xf32, #tpu.memory_space<vmem>>, vector<16x128xf32>,
    return
  }
  func.func @transform_0(%arg0: i32) -> (i32, i32) {
    %c0_i32 = arith.constant 0 : i32
    %c0_i32_0 = arith.constant 0 : i32
    return %arg0, %c0_i32 : i32, i32
  }
  func.func @transform_1(%arg0: i32) -> (i32, i32) {
    %c0_i32 = arith.constant 0 : i32
    %c0_i32_0 = arith.constant 0 : i32
    %c0_i32_1 = arith.constant 0 : i32
    return %c0_i32, %c0_i32_0 : i32, i32
  }
  func.func @transform_2(%arg0: i32) -> (i32, i32) {
    %c0_i32 = arith.constant 0 : i32
    %c0_i32_0 = arith.constant 0 : i32
    return %arg0, %c0_i32 : i32, i32
  }
}

</mosaic_0001>

<bundles_post_ra>
// kernel: tpu_custom_call.1
= control target key start
LH: loop header
LB: loop body
LE: loop exit
PB: predicated region body
PF: predicated region fallthrough
CT: control target
= control target key end

     0   :  { %7 = vsyncpa [#allocation3], 0  ;;  %s242_s0 = inlined_call_operand.hbm [shape: bf16[16,32], index: 0, kind: input, shape index: {}]   ;;  %s243_s1 = inlined_call_operand.hbm [shape: bf16[32,128], index: 1, kind: input, shape index: {}]   ;;  %s244_s2 = inlined_call_operand.hbm [shape: f32[16,128], index: 2, kind: output, shape index: {}]  }
   0x1   :  { %8 = vsyncpa [#allocation6], 0 }
   0x2   :  { %9 = vsyncpa [#allocation4], 0  ;;  %s14_s11 = sshll.u32 %s242_s0, 4  ;;  %s211_s12 = smov [#allocation2]   ;;  %s15_s11 = int_to_ptr.hbm [resolvable:$true] %s14_s11 }
   0x3   :  { %s16_s13 = sshll.u32 %s211_s12, 4  ;;  %s27_s16 = sshll.u32 %s243_s1, 4  ;;  %s17_s13 = int_to_ptr.vmem [resolvable:$true] %s16_s13  ;;  %s28_s16 = int_to_ptr.hbm [resolvable:$true] %s27_s16 }
   0x4   :  { %s212_s17 = smov 64   ;;  %s213_s18 = smov 4  }
   0x5   :  { %22 = dma.hbm_to_vmem [thread:$0]  %s15_s11, 128, %s17_s13, [#allocation3], %s212_s17, %s212_s17, %s213_s18  }
   0x6   :  { %s214_s19 = smov [#allocation5]  }
   0x7   :  { %s29_s20 = sshll.u32 %s214_s19, 4  ;;  %s30_s20 = int_to_ptr.vmem [resolvable:$true] %s29_s20 }
   0x8   :  { %35 = dma.hbm_to_vmem [thread:$0]  %s28_s16, 256, %s30_s20, [#allocation6], %s212_s17, %s212_s17, %s213_s18  }
   0x9   :  { %205 = dma.done.wait [#allocation3], 128  }
   0xa   :  { %206 = vsyncadd [#allocation3], 4294967168 }
   0xb   :  { %207 = dma.done.wait [#allocation6], 256  }
   0xc   :  { %208 = vsyncadd [#allocation6], 4294967040  ;;  %v125_v0 = vld [vmem:[#allocation5 + $0x8] sm:$0xff]  ;;  %v124_v1 = vld [vmem:[#allocation5] sm:$0xff]  ;;  %vm68_vm0 = vcmask 261120   ;;  %s215_s0 = smov [#allocation7]  }
   0xd   :  { %78 = vmatpush.bf16.msra.mxu0 %v125_v0  ;;  %v123_v2 = vld [vmem:[#allocation2] sm:$0xff]  ;;  %s94_s1 = sshll.u32 %s215_s0, 4  ;;  %s96_s23 = sshll.u32 %s244_s2, 4  ;;  %s95_s1 = int_to_ptr.vmem [resolvable:$true] %s94_s1  ;;  %s97_s23 = int_to_ptr.hbm [resolvable:$true] %s96_s23 }
   0xe   :  { %s216_s24 = smov 128   ;;  %s217_s25 = smov 8  }
  0x11   :  { %79 = vmatpush.bf16.msra.mxu0 %v124_v1 }
  0x14   :  { %122 = vmatmul.msk.bf16.vlgmr.msra.gmra.mxu0 %vm68_vm0, %v123_v2 }
  0x91   :  { %v81_v3 = vpop.f32.mrf.mxu0 }
  0x92   :  { %v86_v4 = vmax.f32 %v81_v3, 0.0 }
  0x94   :  { %88 = vst [vmem:[#allocation7] sm:$0xff] %v86_v4 }
  0x99   :  { %v83_v5 = vpop.f32.mrf.mxu0 }
  0x9a   :  { %v87_v6 = vmax.f32 %v83_v5, 0.0 }
  0x9c   :  { %89 = vst [vmem:[#allocation7 + $0x8] sm:$0xff] %v87_v6 }
  0x9d   :  { %102 = dma.vmem_to_hbm [thread:$0]  %s95_s1, 256, %s97_s23, [#allocation4], %s216_s24, %s216_s24, %s217_s25  }
  0x9e   :  { %209 = dma.done.wait [#allocation4], 256  }
  0x9f   :  { %210 = vsyncadd [#allocation4], 4294967040 }
  0xa0   :  { %107 = vsyncpa [#allocation3], 1 }
  0xa1   :  { %108 = vsyncpa [#allocation6], 1 }
  0xa2   :  { %109 = vsyncpa [#allocation4], 1 }

</bundles_post_ra>
